<compile_context>
chip_gen: v5e
topology: v5e:2x2
jax: 0.10.0
libtpu: 0.0.40
codegen_flags: <defaults>
</compile_context>

<pallas_src>
import functools

import jax
import jax.numpy as jnp
from jax.experimental import pallas as pl
from jax.experimental.pallas import tpu as pltpu

BN_EPS = 1e-5


def fused_conv_bn_relu_head_kernel(patches_ref, w_ref, gb_ref, head_ref, o_ref,
                                   *, n_batch, p_out, out_ch):
    # patches_ref : (K, P*N)   im2col'd input, columns ordered (p, n), p-major
    # w_ref       : (Cout, K)  conv weight (bias dropped: cancels under BN)
    # gb_ref      : (Cout, 2)  column 0 = gamma, column 1 = beta
    # head_ref    : (O, P)     Linear weight, SMEM (read as scalars)
    # o_ref       : (O, Cout, N)

    # ---- conv as a single MXU matmul: channels on sublanes, samples on lanes
    conv = jnp.dot(w_ref[...], patches_ref[...],
                   preferred_element_type=jnp.float32)          # (Cout, P*N)

    # ---- training-mode BatchNorm: batch stats over lanes = (N, H', W') ----
    # (correct only because the whole batch lives in this one block; row tiling
    #  would require a two-pass sum/sumsq scheme.)
    mu = jnp.mean(conv, axis=-1, keepdims=True)                 # (Cout, 1)
    var = jnp.mean((conv - mu) ** 2, axis=-1, keepdims=True)    # biased, like torch
    gamma = gb_ref[:, 0:1]                                      # (Cout, 1)
    beta = gb_ref[:, 1:2]                                       # (Cout, 1)
    scale = gamma * jax.lax.rsqrt(var + BN_EPS)                 # (Cout, 1)
    shift = beta - mu * scale
    y = jnp.maximum(conv * scale + shift, 0.0)                  # (Cout, P*N)

    # ---- head: contraction over P (=4) as a VPU FMA chain --------------
    for o in range(out_ch):
        acc = head_ref[o, 0] * y[:, 0:n_batch]
        for p in range(1, p_out):
            acc = acc + head_ref[o, p] * y[:, p * n_batch:(p + 1) * n_batch]
        o_ref[o] = acc                                          # (Cout, N)


def model_forward(x, conv_w, conv_b, gamma, beta, head_w):
    del conv_b  # exact no-op under training-mode BatchNorm (mean-subtracted)

    N, Cin, H, W = x.shape
    Cout = conv_w.shape[0]          # 4
    Ho, Wo = H - 2, W - 2           # VALID 3x3 conv
    P = Ho * Wo                     # must equal Linear in_features (= 4)
    K = Cin * 9
    O = head_w.shape[0]
    assert P == head_w.shape[1], "head in_features must equal H'*W'"

    x = x.astype(jnp.float32)

    # im2col, vectorized over the 9 taps (not over output positions):
    #   rows ordered (ci, dh, dw)  -> matches conv_w.reshape(Cout, Cin*9)
    #   cols ordered (p, n) p-major, p = oh*Wo + ow (torch.flatten order)
    taps = jnp.stack(
        [x[:, :, dh:dh + Ho, dw:dw + Wo] for dh in range(3) for dw in range(3)],
        axis=2)                                          # (N, Cin, 9, Ho, Wo)
    patchesT = taps.transpose(1, 2, 3, 4, 0).reshape(K, P * N)

    wmat = conv_w.reshape(Cout, K).astype(jnp.float32)           # (Cout, K)
    gb = jnp.stack([gamma, beta], axis=1).astype(jnp.float32)    # (Cout, 2)
    head_sm = head_w.astype(jnp.float32)                         # (O, P)

    kernel = functools.partial(fused_conv_bn_relu_head_kernel,
                               n_batch=N, p_out=P, out_ch=O)

    out_ocn = pl.pallas_call(
        kernel,
        out_shape=jax.ShapeDtypeStruct((O, Cout, N), jnp.float32),
        grid=(1,),
        in_specs=[
            pl.BlockSpec((K, P * N), lambda i: (0, 0)),
            pl.BlockSpec((Cout, K), lambda i: (0, 0)),
            pl.BlockSpec((Cout, 2), lambda i: (0, 0)),
            pl.BlockSpec(memory_space=pltpu.MemorySpace.SMEM),
        ],
        out_specs=pl.BlockSpec((O, Cout, N), lambda i: (0, 0, 0)),
    )(patchesT, wmat, gb, head_sm)

    # (O, Cout, N) -> (N, Cout, O): matches torch output (N, 4, out_channels)
    return out_ocn.transpose(2, 1, 0)


def reference_forward(x, conv_w, conv_b, gamma, beta, head_w):
    conv = jax.lax.conv_general_dilated(
        x, conv_w, window_strides=(1, 1), padding="VALID",
        dimension_numbers=("NCHW", "OIHW", "NCHW"),
    ) + conv_b[None, :, None, None]
    mu = conv.mean(axis=(0, 2, 3), keepdims=True)
    var = ((conv - mu) ** 2).mean(axis=(0, 2, 3), keepdims=True)
    y = gamma[None, :, None, None] * (conv - mu) * jax.lax.rsqrt(var + BN_EPS) \
        + beta[None, :, None, None]
    y = jnp.maximum(y, 0.0)
    flat = y.reshape(y.shape[0], y.shape[1], -1)     # (N, 4, H'*W')
    return flat @ head_w.T                           # (N, 4, out_channels)


if __name__ == "__main__":
    in_channels, out_channels = 4, 3
    N, H, W = 2, 4, 4   # 4x4 input -> 2x2 conv out -> flatten size 4 = head in_features

    key = jax.random.PRNGKey(0)
    k_x, k_w, k_b, k_g, k_be, k_h = jax.random.split(key, 6)
    x = jax.random.normal(k_x, (N, in_channels, H, W), dtype=jnp.float32)
    conv_w = jax.random.normal(k_w, (4, in_channels, 3, 3), dtype=jnp.float32) * 0.1
    conv_b = jax.random.normal(k_b, (4,), dtype=jnp.float32) * 0.1
    gamma = 1.0 + 0.1 * jax.random.normal(k_g, (4,), dtype=jnp.float32)
    beta = 0.1 * jax.random.normal(k_be, (4,), dtype=jnp.float32)
    head_w = jax.random.normal(k_h, (out_channels, 4), dtype=jnp.float32) * 0.1

    fwd = jax.jit(model_forward)
    out = jax.block_until_ready(fwd(x, conv_w, conv_b, gamma, beta, head_w))
    ref = jax.block_until_ready(
        reference_forward(x, conv_w, conv_b, gamma, beta, head_w))

    assert out.shape == (N, 4, out_channels), out.shape
    assert jnp.allclose(out, ref, atol=1e-4, rtol=1e-4), (out, ref)
    print("KERNEL_OK")
</pallas_src>

<mosaic_0001>
module attributes {stable_mosaic.version = 11 : i64} {
  func.func @fused_conv_bn_relu_head_kernel(%arg0: i32, %arg1: memref<36x8xf32, #tpu.memory_space<vmem>>, %arg2: memref<4x36xf32, #tpu.memory_space<vmem>>, %arg3: memref<4x2xf32, #tpu.memory_space<vmem>>, %arg4: memref<3x4xf32, #tpu.memory_space<smem>>, %arg5: memref<3x4x2xf32, #tpu.memory_space<vmem>>) attributes {dimension_semantics = [#tpu.dimension_semantics<arbitrary>], iteration_bounds = array<i64: 1>, scalar_prefetch = 0 : i64, scratch_operands = 0 : i64, tpu.core_type = #tpu.core_type<tc>, window_params = [{pipeline_mode = #tpu.pipeline_mode<synchronous>, transform_indices = @transform_0, window_bounds = array<i64: 36, 8>}, {pipeline_mode = #tpu.pipeline_mode<synchronous>, transform_indices = @transform_1, window_bounds = array<i64: 4, 36>}, {pipeline_mode = #tpu.pipeline_mode<synchronous>, transform_indices = @transform_2, window_bounds = array<i64: 4, 2>}, {transform_indices = @transform_3, window_bounds = array<i64: 3, 4>}, {pipeline_mode = #tpu.pipeline_mode<synchronous>, transform_indices = @transform_4, window_bounds = array<i64: 3, 4, 2>}]} {
    %c0 = arith.constant 0 : index
    %c0_0 = arith.constant 0 : index
    %0 = vector.load %arg2[%c0, %c0_0] : memref<4x36xf32, #tpu.memory_space<vmem>>, vector<4x36xf32>
    %c0_1 = arith.constant 0 : index
    %c0_2 = arith.constant 0 : index
    %1 = vector.load %arg1[%c0_1, %c0_2] : memref<36x8xf32, #tpu.memory_space<vmem>>, vector<36x8xf32>
    %cst = arith.constant dense<0.000000e+00> : vector<4x8xf32>
    %2 = tpu.matmul %0, %1, %cst {dimension_numbers = #tpu.dot_dimension_numbers<[1], [0], [0], [1], [0, 0, 1, 1], [], []>} : vector<4x36xf32>, vector<36x8xf32>, vector<4x8xf32> -> vector<4x8xf32>
    %cst_3 = arith.constant dense<0.000000e+00> : vector<4xf32>
    %3 = vector.multi_reduction <add>, %2, %cst_3 [1] : vector<4x8xf32> to vector<4xf32>
    %4 = vector.shape_cast %3 : vector<4xf32> to vector<4x1xf32>
    %cst_4 = arith.constant 8.000000e+00 : f32
    %5 = vector.broadcast %cst_4 : f32 to vector<4x1xf32>
    %6 = arith.divf %4, %5 : vector<4x1xf32>
    %7 = vector.broadcast %6 : vector<4x1xf32> to vector<4x8xf32>
    %8 = arith.subf %2, %7 : vector<4x8xf32>
    %9 = arith.mulf %8, %8 : vector<4x8xf32>
    %cst_5 = arith.constant dense<0.000000e+00> : vector<4xf32>
    %10 = vector.multi_reduction <add>, %9, %cst_5 [1] : vector<4x8xf32> to vector<4xf32>
    %11 = vector.shape_cast %10 : vector<4xf32> to vector<4x1xf32>
    %cst_6 = arith.constant 8.000000e+00 : f32
    %12 = vector.broadcast %cst_6 : f32 to vector<4x1xf32>
    %13 = arith.divf %11, %12 : vector<4x1xf32>
    %c0_7 = arith.constant 0 : index
    %c0_8 = arith.constant 0 : index
    %14 = vector.load %arg3[%c0_7, %c0_8] : memref<4x2xf32, #tpu.memory_space<vmem>>, vector<4x1xf32>
    %c0_9 = arith.constant 0 : index
    %c1 = arith.constant 1 : index
    %15 = vector.load %arg3[%c0_9, %c1] : memref<4x2xf32, #tpu.memory_space<vmem>>, vector<4x1xf32>
    %cst_10 = arith.constant 9.99999974E-6 : f32
    %16 = vector.broadcast %cst_10 : f32 to vector<4x1xf32>
    %17 = arith.addf %13, %16 : vector<4x1xf32>
    %18 = math.rsqrt %17 : vector<4x1xf32>
    %19 = arith.mulf %14, %18 : vector<4x1xf32>
    %20 = arith.mulf %6, %19 : vector<4x1xf32>
    %21 = arith.subf %15, %20 : vector<4x1xf32>
    %22 = vector.broadcast %19 : vector<4x1xf32> to vector<4x8xf32>
    %23 = arith.mulf %2, %22 : vector<4x8xf32>
    %24 = vector.broadcast %21 : vector<4x1xf32> to vector<4x8xf32>
    %25 = arith.addf %23, %24 : vector<4x8xf32>
    %cst_11 = arith.constant 0.000000e+00 : f32
    %26 = vector.broadcast %cst_11 : f32 to vector<4x8xf32>
    %27 = arith.maximumf %25, %26 : vector<4x8xf32>
    %c0_12 = arith.constant 0 : index
    %c0_13 = arith.constant 0 : index
    %28 = memref.load %arg4[%c0_12, %c0_13] : memref<3x4xf32, #tpu.memory_space<smem>>
    %29 = vector.extract_strided_slice %27 {offsets = [0, 0], sizes = [4, 2], strides = [1, 1]} : vector<4x8xf32> to vector<4x2xf32>
    %30 = vector.broadcast %28 : f32 to vector<4x2xf32>
    %31 = arith.mulf %30, %29 : vector<4x2xf32>
    %c0_14 = arith.constant 0 : index
    %c1_15 = arith.constant 1 : index
    %32 = memref.load %arg4[%c0_14, %c1_15] : memref<3x4xf32, #tpu.memory_space<smem>>
    %33 = vector.extract_strided_slice %27 {offsets = [0, 2], sizes = [4, 2], strides = [1, 1]} : vector<4x8xf32> to vector<4x2xf32>
    %34 = vector.broadcast %32 : f32 to vector<4x2xf32>
    %35 = arith.mulf %34, %33 : vector<4x2xf32>
    %36 = arith.addf %31, %35 : vector<4x2xf32>
    %c0_16 = arith.constant 0 : index
    %c2 = arith.constant 2 : index
    %37 = memref.load %arg4[%c0_16, %c2] : memref<3x4xf32, #tpu.memory_space<smem>>
    %38 = vector.extract_strided_slice %27 {offsets = [0, 4], sizes = [4, 2], strides = [1, 1]} : vector<4x8xf32> to vector<4x2xf32>
    %39 = vector.broadcast %37 : f32 to vector<4x2xf32>
    %40 = arith.mulf %39, %38 : vector<4x2xf32>
    %41 = arith.addf %36, %40 : vector<4x2xf32>
    %c0_17 = arith.constant 0 : index
    %c3 = arith.constant 3 : index
    %42 = memref.load %arg4[%c0_17, %c3] : memref<3x4xf32, #tpu.memory_space<smem>>
    %43 = vector.extract_strided_slice %27 {offsets = [0, 6], sizes = [4, 2], strides = [1, 1]} : vector<4x8xf32> to vector<4x2xf32>
    %44 = vector.broadcast %42 : f32 to vector<4x2xf32>
    %45 = arith.mulf %44, %43 : vector<4x2xf32>
    %46 = arith.addf %41, %45 : vector<4x2xf32>
    %c0_18 = arith.constant 0 : index
    %c0_19 = arith.constant 0 : index
    %c0_20 = arith.constant 0 : index
    %47 = vector.load %arg5[%c0_18, %c0_19, %c0_20] : memref<3x4x2xf32, #tpu.memory_space<vmem>>, vector<1x4x2xf32>
    %48 = vector.shape_cast %47 : vector<1x4x2xf32> to vector<4x2xf32>
    %49 = vector.shape_cast %46 : vector<4x2xf32> to vector<1x4x2xf32>
    tpu.vector_store %arg5[%c0_18, %c0_19, %c0_20], %49 {strides = array<i32>} : memref<3x4x2xf32, #tpu.memory_space<vmem>>, vector<1x4x2xf32>,
    %c1_21 = arith.constant 1 : index
    %c0_22 = arith.constant 0 : index
    %50 = memref.load %arg4[%c1_21, %c0_22] : memref<3x4xf32, #tpu.memory_space<smem>>
    %51 = vector.extract_strided_slice %27 {offsets = [0, 0], sizes = [4, 2], strides = [1, 1]} : vector<4x8xf32> to vector<4x2xf32>
    %52 = vector.broadcast %50 : f32 to vector<4x2xf32>
    %53 = arith.mulf %52, %51 : vector<4x2xf32>
    %c1_23 = arith.constant 1 : index
    %c1_24 = arith.constant 1 : index
    %54 = memref.load %arg4[%c1_23, %c1_24] : memref<3x4xf32, #tpu.memory_space<smem>>
    %55 = vector.extract_strided_slice %27 {offsets = [0, 2], sizes = [4, 2], strides = [1, 1]} : vector<4x8xf32> to vector<4x2xf32>
    %56 = vector.broadcast %54 : f32 to vector<4x2xf32>
    %57 = arith.mulf %56, %55 : vector<4x2xf32>
    %58 = arith.addf %53, %57 : vector<4x2xf32>
    %c1_25 = arith.constant 1 : index
    %c2_26 = arith.constant 2 : index
    %59 = memref.load %arg4[%c1_25, %c2_26] : memref<3x4xf32, #tpu.memory_space<smem>>
    %60 = vector.extract_strided_slice %27 {offsets = [0, 4], sizes = [4, 2], strides = [1, 1]} : vector<4x8xf32> to vector<4x2xf32>
    %61 = vector.broadcast %59 : f32 to vector<4x2xf32>
    %62 = arith.mulf %61, %60 : vector<4x2xf32>
    %63 = arith.addf %58, %62 : vector<4x2xf32>
    %c1_27 = arith.constant 1 : index
    %c3_28 = arith.constant 3 : index
    %64 = memref.load %arg4[%c1_27, %c3_28] : memref<3x4xf32, #tpu.memory_space<smem>>
    %65 = vector.extract_strided_slice %27 {offsets = [0, 6], sizes = [4, 2], strides = [1, 1]} : vector<4x8xf32> to vector<4x2xf32>
    %66 = vector.broadcast %64 : f32 to vector<4x2xf32>
    %67 = arith.mulf %66, %65 : vector<4x2xf32>
    %68 = arith.addf %63, %67 : vector<4x2xf32>
    %c1_29 = arith.constant 1 : index
    %c0_30 = arith.constant 0 : index
    %c0_31 = arith.constant 0 : index
    %69 = vector.load %arg5[%c1_29, %c0_30, %c0_31] : memref<3x4x2xf32, #tpu.memory_space<vmem>>, vector<1x4x2xf32>
    %70 = vector.shape_cast %69 : vector<1x4x2xf32> to vector<4x2xf32>
    %71 = vector.shape_cast %68 : vector<4x2xf32> to vector<1x4x2xf32>
    tpu.vector_store %arg5[%c1_29, %c0_30, %c0_31], %71 {strides = array<i32>} : memref<3x4x2xf32, #tpu.memory_space<vmem>>, vector<1x4x2xf32>,
    %c2_32 = arith.constant 2 : index
    %c0_33 = arith.constant 0 : index
    %72 = memref.load %arg4[%c2_32, %c0_33] : memref<3x4xf32, #tpu.memory_space<smem>>
    %73 = vector.extract_strided_slice %27 {offsets = [0, 0], sizes = [4, 2], strides = [1, 1]} : vector<4x8xf32> to vector<4x2xf32>
    %74 = vector.broadcast %72 : f32 to vector<4x2xf32>
    %75 = arith.mulf %74, %73 : vector<4x2xf32>
    %c2_34 = arith.constant 2 : index
    %c1_35 = arith.constant 1 : index
    %76 = memref.load %arg4[%c2_34, %c1_35] : memref<3x4xf32, #tpu.memory_space<smem>>
    %77 = vector.extract_strided_slice %27 {offsets = [0, 2], sizes = [4, 2], strides = [1, 1]} : vector<4x8xf32> to vector<4x2xf32>
    %78 = vector.broadcast %76 : f32 to vector<4x2xf32>
    %79 = arith.mulf %78, %77 : vector<4x2xf32>
    %80 = arith.addf %75, %79 : vector<4x2xf32>
    %c2_36 = arith.constant 2 : index
    %c2_37 = arith.constant 2 : index
    %81 = memref.load %arg4[%c2_36, %c2_37] : memref<3x4xf32, #tpu.memory_space<smem>>
    %82 = vector.extract_strided_slice %27 {offsets = [0, 4], sizes = [4, 2], strides = [1, 1]} : vector<4x8xf32> to vector<4x2xf32>
    %83 = vector.broadcast %81 : f32 to vector<4x2xf32>
    %84 = arith.mulf %83, %82 : vector<4x2xf32>
    %85 = arith.addf %80, %84 : vector<4x2xf32>
    %c2_38 = arith.constant 2 : index
    %c3_39 = arith.constant 3 : index
    %86 = memref.load %arg4[%c2_38, %c3_39] : memref<3x4xf32, #tpu.memory_space<smem>>
    %87 = vector.extract_strided_slice %27 {offsets = [0, 6], sizes = [4, 2], strides = [1, 1]} : vector<4x8xf32> to vector<4x2xf32>
    %88 = vector.broadcast %86 : f32 to vector<4x2xf32>
    %89 = arith.mulf %88, %87 : vector<4x2xf32>
    %90 = arith.addf %85, %89 : vector<4x2xf32>
    %c2_40 = arith.constant 2 : index
    %c0_41 = arith.constant 0 : index
    %c0_42 = arith.constant 0 : index
    %91 = vector.load %arg5[%c2_40, %c0_41, %c0_42] : memref<3x4x2xf32, #tpu.memory_space<vmem>>, vector<1x4x2xf32>
    %92 = vector.shape_cast %91 : vector<1x4x2xf32> to vector<4x2xf32>
    %93 = vector.shape_cast %90 : vector<4x2xf32> to vector<1x4x2xf32>
    tpu.vector_store %arg5[%c2_40, %c0_41, %c0_42], %93 {strides = array<i32>} : memref<3x4x2xf32, #tpu.memory_space<vmem>>, vector<1x4x2xf32>,
    return
  }
  func.func @transform_0(%arg0: i32) -> (i32, i32) {
    %c0_i32 = arith.constant 0 : i32
    %c0_i32_0 = arith.constant 0 : i32
    %c0_i32_1 = arith.constant 0 : i32
    return %c0_i32, %c0_i32_0 : i32, i32
  }
  func.func @transform_1(%arg0: i32) -> (i32, i32) {
    %c0_i32 = arith.constant 0 : i32
    %c0_i32_0 = arith.constant 0 : i32
    %c0_i32_1 = arith.constant 0 : i32
    return %c0_i32, %c0_i32_0 : i32, i32
  }
  func.func @transform_2(%arg0: i32) -> (i32, i32) {
    %c0_i32 = arith.constant 0 : i32
    %c0_i32_0 = arith.constant 0 : i32
    %c0_i32_1 = arith.constant 0 : i32
    return %c0_i32, %c0_i32_0 : i32, i32
  }
  func.func @transform_3(%arg0: i32) -> (i32, i32) {
    %c0_i32 = arith.constant 0 : i32
    %c0_i32_0 = arith.constant 0 : i32
    %c0_i32_1 = arith.constant 0 : i32
    return %c0_i32, %c0_i32_0 : i32, i32
  }
  func.func @transform_4(%arg0: i32) -> (i32, i32, i32) {
    %c0_i32 = arith.constant 0 : i32
    %c0_i32_0 = arith.constant 0 : i32
    %c0_i32_1 = arith.constant 0 : i32
    %c0_i32_2 = arith.constant 0 : i32
    return %c0_i32, %c0_i32_0, %c0_i32_1 : i32, i32, i32
  }
}

</mosaic_0001>

<bundles_post_ra>
// kernel: model_forward.1
= control target key start
LH: loop header
LB: loop body
LE: loop exit
PB: predicated region body
PF: predicated region fallthrough
CT: control target
= control target key end

     0   :  { %9 = vsyncpa [#allocation3], 0  ;;  %s250_s18 = smov [#allocation2]   ;;  %s318_s0 = inlined_call_operand.vmem [shape: f32[36,8], index: 0, kind: input, shape index: {}]   ;;  %s319_s1 = inlined_call_operand.vmem [shape: f32[4,36], index: 1, kind: input, shape index: {}]   ;;  %s320_s2 = inlined_call_operand.vmem [shape: f32[4,2], index: 2, kind: input, shape index: {}]   ;;  %s321_s3 = inlined_call_operand.vmem [shape: f32[3,4], index: 3, kind: input, shape index: {}]   ;;  %s322_s4 = inlined_call_operand.vmem [shape: f32[3,4,2], index: 4, kind: output, shape index: {}]  }
   0x1   :  { %s21_s17 = sshll.u32 %s321_s3, 4  ;;  %s22_s17 = int_to_ptr.vmem [resolvable:$true] %s21_s17 }
   0x2   :  { %24 = dma.vmem_to_smem %s22_s17, 64, %s250_s18, [#allocation3]  }
   0x3   :  { %248 = dma.done.wait [#allocation3], 64  }
   0x4   :  { %249 = vsyncadd [#allocation3], 4294967232 }
   0x5   :  { %29 = sfence }
   0x6   :  { %v35_v0 = vld [vmem:[%s318_s0 + $0x20] sm:$0xf]  ;;  %vm40_vm0 = vcmask 1043456   ;;  %v34_v1 = vld [vmem:[%s318_s0 + $0x18] sm:$0xff]  ;;  %v33_v2 = vld [vmem:[%s318_s0 + $0x10] sm:$0xff]  ;;  %vm36_vm1 = vcmask 293888  }
   0x7   :  { %206 = vmatpush.msk.msra.mxu0 %vm40_vm0, %v35_v0  ;;  %v32_v3 = vld [vmem:[%s318_s0 + $0x8] sm:$0xff]  ;;  %v31_v4 = vld [vmem:[%s318_s0] sm:$0xff]  ;;  %vm64_vm2 = vcmask 60416   ;;  %v251_v8 = vmov 8.0   ;;  %v252_v20 = vmov 0   ;;  %s253_s30 = smov 1  }
   0x8   :  { %v30_v5 = vld [vmem:[%s319_s1] sm:$0xf]  ;;  %232 = vrcp.f32 %v251_v8  ;;  %229 = vset.pattern.permute.xlu1 %v252_v20  ;;  %v254_v34 = vmov 1   ;;  %s217_s5 = sld [smem:[#allocation2 + $0x101]]  ;;  %s255_s10 = smov 126   ;;  %vm141_vm7 = vcmask 11264  }
   0x9   :  { %56 = vmatpush.msra.mxu0 %v34_v1  ;;  %v82_v29 = vld [vmem:[%s320_s2] sm:$0xf]  ;;  %230 = vset.pattern.permute.xlu2 %v254_v34  ;;  %s212_s6 = sld [smem:[#allocation2 + $0x81]]  ;;  %s256_s13 = smov 124  }
   0xa   :  { %231 = vset.pattern.permute.xlu0 %v254_v34  ;;  %s208_s7 = sld [smem:[#allocation2 + $0x1]]  ;;  %s257_s14 = smov 122  }
   0xb   :  { %57 = vmatpush.msra.mxu0 %v33_v2  ;;  %s213_s2 = sld [smem:[#allocation2 + $0x82]] }
   0xc   :  { %s219_s8 = sld [smem:[#allocation2 + $0x103]] }
   0xd   :  { %58 = vmatpush.msra.mxu0 %v32_v3  ;;  %s209_s9 = sld [smem:[#allocation2 + $0x2]] }
   0xe   :  { %v233_v9 = vpop.eup %232  ;;  %v176_v41 = vstv %s217_s5  ;;  %s210_s11 = sld [smem:[#allocation2 + $0x3]] }
   0xf   :  { %59 = vmatpush.msra.mxu0 %v31_v4  ;;  %v69_v10 = vmul.f32 8.0, %v233_v9  ;;  %vm73_vm3 = vweird.f32 %v233_v9  ;;  %v147_v42 = vstv %s212_s6  ;;  %s218_s12 = sld [smem:[#allocation2 + $0x102]] }
  0x10   :  { %207 = vmatmul.msk.f32.vlgmr.msra.gmra.mxu0 %vm36_vm1, %v30_v5  ;;  %v118_v43 = vstv %s208_s7  ;;  %s214_s15 = sld [smem:[#allocation2 + $0x83]] }
  0x11   :  { %v70_v11 = vsub.f32 1.0, %v69_v10  ;;  %v155_v48 = vstv %s213_s2  ;;  %s216_s16 = sld [smem:[#allocation2 + $0x100]] }
  0x12   :  { %v192_v49 = vstv %s219_s8  ;;  %s211_s17 = sld [smem:[#allocation2 + $0x80]] }
  0x13   :  { %v71_v12 = vmul.f32 %v233_v9, %v70_v11  ;;  %v126_v50 = vstv %s209_s9  ;;  %s114_s18 = sld [smem:[#allocation2]] }
  0x14   :  { %v134_v54 = vstv %s210_s11 }
  0x15   :  { %v72_v13 = vadd.f32 %v233_v9, %v71_v12  ;;  %v184_v55 = vstv %s218_s12 }
  0x16   :  { %v163_v58 = vstv %s214_s15 }
  0x17   :  { %v74_v14 = vsel %vm73_vm3, %v233_v9, %v72_v13  ;;  %v173_v62 = vstv %s216_s16 }
  0x18   :  { %v144_v3 = vstv %s211_s17 }
  0x19   :  { %v115_v8 = vstv %s114_s18 }
  0x8d   :  { %v61_v6 = vpop.f32.mrf.mxu0 }
  0x8e   :  { %v65_v7 = vsel %vm64_vm2, %v61_v6, 0.0 }
  0x8f   :  { %66 = vadd.xlane.f32.xlu0 %v65_v7 }
 0x102   :  { %v67_v15 = vpop.xlane.xlu0 %66 }
 0x103   :  { %v75_v16 = vmul.f32 %v74_v14, %v67_v15 }
 0x105   :  { %v76_v17 = vsub.f32 %v61_v6, %v75_v16 }
 0x107   :  { %v77_v18 = vmul.f32 %v76_v17, %v76_v17 }
 0x109   :  { %v78_v19 = vsel %vm64_vm2, %v77_v18, 0.0 }
 0x10a   :  { %79 = vadd.xlane.f32.xlu0 %v78_v19 }
 0x17d   :  { %v80_v21 = vpop.xlane.xlu0 %79 }
 0x17e   :  { %v81_v22 = vmul.f32 %v80_v21, %v74_v14 }
 0x180   :  { %v83_v23 = vadd.f32 1e-05, %v81_v22 }
 0x182   :  { %234 = vrsqrt.f32 %v83_v23  ;;  %vm90_vm5 = vweird.f32 %v83_v23 }
 0x188   :  { %v235_v24 = vpop.eup %234 }
 0x189   :  { %v85_v25 = vmul.f32 %v235_v24, %v83_v23  ;;  %vm91_vm4 = vweird.f32 %v235_v24 }
 0x18a   :  { %vm92_vm6 = vmor %vm90_vm5, %vm91_vm4 }
 0x18b   :  { %v86_v26 = vmul.f32 %v235_v24, %v85_v25 }
 0x18d   :  { %v87_v27 = vmul.f32 0.5, %v86_v26 }
 0x18f   :  { %v88_v28 = vsub.f32 1.5, %v87_v27 }
 0x191   :  { %v89_v30 = vmul.f32 %v235_v24, %v88_v28 }
 0x193   :  { %v93_v31 = vsel %vm92_vm6, %v235_v24, %v89_v30 }
 0x194   :  { %v94_v32 = vmul.f32 %v93_v31, %v82_v29 }
 0x196   :  { %v95_v33 = vmul.f32 %v94_v32, %v75_v16 }
 0x198   :  { %97 = vrot.lane.b32.xlu1 %v95_v33, %s253_s30 }
 0x1a0   :  { %103 = vperm.xlu1 %229, %v94_v32  }
 0x20a   :  { %v98_v35 = vpop.permute.xlu1 %97 }
 0x20b   :  { %v100_v36 = vsub.f32 %v82_v29, %v98_v35 }
 0x20d   :  { %109 = vperm.xlu2 %230, %v100_v36  }
 0x212   :  { %v104_v37 = vpop.permute.xlu1 %103 }
 0x213   :  { %v106_v38 = vmul.f32 %v104_v37, %v61_v6 }
 0x267   :  { %v110_v39 = vpop.permute.xlu2 %109 }
 0x268   :  { %v112_v40 = vadd.f32 %v110_v39, %v106_v38 }
 0x26a   :  { %v113_v44 = vmax.f32 %v112_v40, 0.0 }
 0x26c   :  { %v177_v45 = vmul.f32 %v176_v41, %v113_v44  ;;  %v148_v46 = vmul.f32 %v147_v42, %v113_v44  ;;  %v119_v47 = vmul.f32 %v118_v43, %v113_v44  ;;  %v156_v51 = vmul.f32 %v155_v48, %v113_v44 }
 0x26d   :  { %v193_v52 = vmul.f32 %v192_v49, %v113_v44  ;;  %v127_v53 = vmul.f32 %v126_v50, %v113_v44  ;;  %v135_v56 = vmul.f32 %v134_v54, %v113_v44  ;;  %v185_v57 = vmul.f32 %v184_v55, %v113_v44 }
 0x26e   :  { %179 = vrot.lane.b32.xlu1 %v177_v45, %s255_s10  ;;  %150 = vrot.lane.b32.xlu0 %v148_v46, %s255_s10  ;;  %v164_v59 = vmul.f32 %v163_v58, %v113_v44  ;;  %v174_v2 = vmul.f32 %v173_v62, %v113_v44  ;;  %v145_v5 = vmul.f32 %v144_v3, %v113_v44 }
 0x26f   :  { %121 = vrot.lane.b32.xlu2 %v119_v47, %s255_s10  ;;  %v116_v14 = vmul.f32 %v115_v8, %v113_v44 }
 0x276   :  { %158 = vrot.lane.b32.xlu1 %v156_v51, %s256_s13  ;;  %195 = vrot.lane.b32.xlu0 %v193_v52, %s257_s14 }
 0x277   :  { %129 = vrot.lane.b32.xlu2 %v127_v53, %s256_s13 }
 0x27e   :  { %137 = vrot.lane.b32.xlu1 %v135_v56, %s257_s14 }
 0x27f   :  { %187 = vrot.lane.b32.xlu2 %v185_v57, %s256_s13 }
 0x287   :  { %166 = vrot.lane.b32.xlu2 %v164_v59, %s257_s14 }
 0x2c9   :  { %v122_v60 = vpop.permute.xlu2 %121 }
 0x2ca   :  { %v124_v16 = vadd.f32 %v122_v60, %v116_v14 }
 0x2d1   :  { %v130_v61 = vpop.permute.xlu2 %129 }
 0x2d2   :  { %v132_v17 = vadd.f32 %v130_v61, %v124_v16 }
 0x2d9   :  { %v188_v63 = vpop.permute.xlu2 %187 }
 0x2e0   :  { %v180_v0 = vpop.permute.xlu1 %179  ;;  %v151_v1 = vpop.permute.xlu0 %150 }
 0x2e1   :  { %v182_v4 = vadd.f32 %v180_v0, %v174_v2  ;;  %v153_v6 = vadd.f32 %v151_v1, %v145_v5  ;;  %v167_v13 = vpop.permute.xlu2 %166 }
 0x2e3   :  { %v190_v7 = vadd.f32 %v188_v63, %v182_v4 }
 0x2e8   :  { %v159_v9 = vpop.permute.xlu1 %158  ;;  %v196_v10 = vpop.permute.xlu0 %195 }
 0x2e9   :  { %v161_v11 = vadd.f32 %v159_v9, %v153_v6  ;;  %v198_v12 = vadd.f32 %v196_v10, %v190_v7 }
 0x2eb   :  { %v169_v15 = vadd.f32 %v167_v13, %v161_v11  ;;  %220 = vst.msk [vmem:[%s322_s4 + $0x8] sm:$0xf] %vm141_vm7, %v198_v12 }
 0x2ed   :  { %215 = vst.msk [vmem:[%s322_s4 + $0x4] sm:$0xf] %vm141_vm7, %v169_v15 }
 0x2f0   :  { %v138_v18 = vpop.permute.xlu1 %137 }
 0x2f1   :  { %v140_v19 = vadd.f32 %v138_v18, %v132_v17 }
 0x2f3   :  { %142 = vst.msk [vmem:[%s322_s4] sm:$0xf] %vm141_vm7, %v140_v19 }
 0x2f4   :  { %205 = vsyncpa [#allocation3], 1 }

</bundles_post_ra>
